<compile_context>
chip_gen: v7x
topology: tpu7x:2x2x1
jax: 0.10.0
libtpu: 0.0.40
codegen_flags: <defaults>
</compile_context>

<pallas_src>
import functools
import math

import jax
import jax.numpy as jnp
from jax.experimental import pallas as pl
from jax.experimental.pallas import tpu as pltpu


def _log_softmax(z):
    zmax = jnp.max(z, axis=-1, keepdims=True)
    shifted = z - zmax
    return shifted - jnp.log(jnp.sum(jnp.exp(shifted), axis=-1, keepdims=True))


def distiller_kernel(x_ref, w1t_ref, sh_ref, poolm_ref, w2_ref, b2_ref,
                     s_out_ref, loss_ref, *, n_valid):
    B, C, S = x_ref.shape          # (batch, in-channels, H*W), bf16
    KP = w2_ref.shape[1] // 2      # lane-padded classes per net (multiple of 128)

    # Merge the batch axis into lanes with a lane-aligned concat: (C, B*S), bf16.
    # TODO(synk): for larger B, present x as (C, B*S) from the wrapper or make B
    # a grid axis instead of this in-kernel concat.
    xc = jnp.concatenate([x_ref[b] for b in range(B)], axis=-1)

    # Fused teacher+student 1x1 conv with the BN scale pre-folded into w1t:
    #   (F, C)bf16 @ (C, B*S)bf16 -> (F, B*S)f32,   F = F_teacher + F_student
    # TODO(synk): with realistic (larger) C the MXU is the right unit; at C=4 the
    # contraction uses ~1.5% of the MXU depth and a VPU multiply-add chain would
    # also work — latency-bound at toy sizes either way.
    h = jax.lax.dot_general(w1t_ref[...], xc,
                            (((1,), (0,)), ((), ())),
                            preferred_element_type=jnp.float32)

    # Folded BatchNorm2d (eval) shift + ReLU (f32 VPU; v5e has no bf16 VPU).
    h = jnp.maximum(h + sh_ref[...], 0.0)

    # Global average pool per batch on the MXU with the precomputed (B, B*S)
    # averaging matrix: pooled = poolm @ h^T -> (B, F), classifier-ready.
    # bf16 operands, f32 accumulation (1/S is exact in bf16).
    # TODO(synk): at realistic B*S this dense matrix is O(B^2*S); switch to a
    # per-batch-tile segment reduction with a grid over B (see wrapper TODO).
    pooled = jax.lax.dot_general(poolm_ref[...], h.astype(jnp.bfloat16),
                                 (((1,), (1,)), ((), ())),
                                 preferred_element_type=jnp.float32)   # (B, F)

    # Block-diagonal classifier head, lane-aligned: teacher -> [:, :KP],
    # student -> [:, KP:].  Padded class lanes carry a -1e30 bias, so they get
    # probability exactly 0 after softmax and contribute 0 to the KL sum
    # (both log-probs stay finite at -1e30, p_t is exactly 0).
    logits = jnp.dot(pooled.astype(jnp.bfloat16), w2_ref[...],
                     preferred_element_type=jnp.float32) + b2_ref[...]  # (B, 2*KP)
    t_out = logits[:, :KP]
    s_out = logits[:, KP:]

    # loss_distill = KLDivLoss()(log_softmax(s_out/T, 1), softmax(t_out/T, 1))
    # Module uses temperature = 1 (division omitted) and PyTorch's default
    # reduction='mean' -> element-wise mean over B * n_valid real classes.
    log_p_s = _log_softmax(s_out)
    log_p_t = _log_softmax(t_out)
    p_t = jnp.exp(log_p_t)
    kl = p_t * (log_p_t - log_p_s)

    s_out_ref[...] = s_out                     # (B, KP): full-lane unmasked store
    loss_ref[0, 0] = jnp.sum(kl) * jnp.float32(1.0 / (B * n_valid))


def make_net_params(key, c_in, c_feat, n_classes):
    """Synthetic per-net params mirroring build_feature_connector-style init."""
    k1, k2 = jax.random.split(key)
    # Conv2d(c_in, c_feat, k=1, bias=False): weight ~ N(0, sqrt(2 / (1*1*c_feat)))
    w1 = jax.random.normal(k1, (c_in, c_feat), jnp.float32) * math.sqrt(2.0 / c_feat)
    # BatchNorm2d(c_feat), eval mode, fresh stats: gamma=1, beta=0, mean=0, var=1
    gamma = jnp.ones((c_feat,), jnp.float32)
    beta = jnp.zeros((c_feat,), jnp.float32)
    running_mean = jnp.zeros((c_feat,), jnp.float32)
    running_var = jnp.ones((c_feat,), jnp.float32)
    eps = 1e-5
    inv_std = gamma / jnp.sqrt(running_var + eps)
    scale = inv_std                                   # (c_feat,)
    shift = beta - running_mean * inv_std             # (c_feat,)
    # Linear(c_feat, n_classes) classifier head
    w2 = jax.random.normal(k2, (c_feat, n_classes), jnp.float32) * 0.01
    b2 = jnp.zeros((n_classes,), jnp.float32)
    return w1, scale, shift, w2, b2


def fuse_params(t_params, s_params, n_classes):
    """Concatenate teacher/student params so both nets run in one fused pass."""
    tw1, tsc, tsh, tw2, tb2 = t_params
    sw1, ssc, ssh, sw2, sb2 = s_params
    ft, fs = tw1.shape[1], sw1.shape[1]
    f_tot = ft + fs
    kp = ((n_classes + 127) // 128) * 128    # lane-aligned classes per net

    # (F, C) conv weight with BN scale folded in f32 FIRST, then one bf16 cast.
    w1t = jnp.concatenate([tw1.T * tsc[:, None], sw1.T * ssc[:, None]], axis=0)
    w1t = w1t.astype(jnp.bfloat16)
    shift = jnp.concatenate([tsh, ssh], axis=0).reshape(f_tot, 1)        # f32

    # Lane-aligned block-diagonal head (F, 2*KP), bf16 for the MXU.
    w2 = jnp.zeros((f_tot, 2 * kp), jnp.float32)
    w2 = w2.at[:ft, :n_classes].set(tw2).at[ft:, kp:kp + n_classes].set(sw2)
    w2 = w2.astype(jnp.bfloat16)
    # Bias: real classes get the real bias, padded lanes get -1e30 (softmax mask).
    b2 = jnp.full((1, 2 * kp), -1e30, jnp.float32)
    b2 = b2.at[0, :n_classes].set(tb2).at[0, kp:kp + n_classes].set(sb2)
    return w1t, shift, w2, b2, kp


def make_pool_matrix(batch, spatial):
    """(B, B*S) per-batch averaging matrix, built once in the wrapper (bf16)."""
    lane = jnp.arange(batch * spatial, dtype=jnp.int32)[None, :]
    seg0 = (jnp.arange(batch, dtype=jnp.int32) * spatial)[:, None]
    poolm = jnp.where((lane >= seg0) & (lane < seg0 + spatial),
                      jnp.float32(1.0 / spatial), jnp.float32(0.0))
    return poolm.astype(jnp.bfloat16)   # 1/256 is exact in bf16


def distiller_forward(x_nchw, fused_params, n_classes):
    w1t, shift, w2, b2, kp = fused_params
    B, C, H, W = x_nchw.shape
    S = H * W
    # NCHW -> (B, C, H*W): free metadata reshape; bf16 halves the HBM->VMEM DMA.
    x = x_nchw.reshape(B, C, S).astype(jnp.bfloat16)
    poolm = make_pool_matrix(B, S)

    vmem = pl.BlockSpec(memory_space=pltpu.MemorySpace.VMEM)
    smem = pl.BlockSpec(memory_space=pltpu.MemorySpace.SMEM)
    # TODO(synk): at realistic B/H/W, add a grid over B (or B*HW tiles) with
    # dimension_semantics=("parallel",) so both v7x TensorCores are used, do the
    # GAP as a per-tile segment reduction into a VMEM accumulator instead of the
    # dense poolm, and size tiles per generation (v7x 64 MiB VMEM / 32 MiB scoped
    # default vs v5e/v6e 128 MiB; raise vmem_limit_bytes on v6e). At these toy
    # sizes a single grid-less invocation is fastest.
    s_out_full, loss = pl.pallas_call(
        functools.partial(distiller_kernel, n_valid=n_classes),
        out_shape=(jax.ShapeDtypeStruct((B, kp), jnp.float32),
                   jax.ShapeDtypeStruct((1, 1), jnp.float32)),
        in_specs=[vmem] * 6,
        out_specs=(vmem, smem),
    )(x, w1t, shift, poolm, w2, b2)

    # Matches PyTorch: return (s_out, 0, loss_distill); drop the padded lanes here.
    return s_out_full[:, :n_classes], 0, loss[0, 0]


if __name__ == "__main__":
    key = jax.random.PRNGKey(0)
    kx, kt, ks = jax.random.split(key, 3)

    B, C, H, W = 2, 4, 16, 16
    n_classes = 10
    teacher_feat = 32   # teacher is wider
    student_feat = 16   # student is narrower

    x = jax.random.normal(kx, (B, C, H, W), jnp.float32)
    t_params = make_net_params(kt, C, teacher_feat, n_classes)
    s_params = make_net_params(ks, C, student_feat, n_classes)
    fused = fuse_params(t_params, s_params, n_classes)

    s_out, zero, loss = distiller_forward(x, fused, n_classes)
    jax.block_until_ready((s_out, loss))

    assert s_out.shape == (B, n_classes)
    assert loss.shape == ()
    assert bool(jnp.isfinite(loss))
    print("KERNEL_OK")
</pallas_src>

<mosaic_0001>
module attributes {stable_mosaic.version = 11 : i64} {
  func.func @distiller_kernel(%arg0: memref<2x4x256xbf16, #tpu.memory_space<vmem>>, %arg1: memref<48x4xbf16, #tpu.memory_space<vmem>>, %arg2: memref<48x1xf32, #tpu.memory_space<vmem>>, %arg3: memref<2x512xbf16, #tpu.memory_space<vmem>>, %arg4: memref<48x256xbf16, #tpu.memory_space<vmem>>, %arg5: memref<1x256xf32, #tpu.memory_space<vmem>>, %arg6: memref<2x128xf32, #tpu.memory_space<vmem>>, %arg7: memref<1x1xf32, #tpu.memory_space<smem>>) attributes {dimension_semantics = [], scalar_prefetch = 0 : i64, scratch_operands = 0 : i64, tpu.core_type = #tpu.core_type<tc>} {
    %c0 = arith.constant 0 : index
    %c0_0 = arith.constant 0 : index
    %c0_1 = arith.constant 0 : index
    %0 = vector.load %arg0[%c0, %c0_0, %c0_1] : memref<2x4x256xbf16, #tpu.memory_space<vmem>>, vector<1x4x256xbf16>
    %1 = vector.shape_cast %0 : vector<1x4x256xbf16> to vector<4x256xbf16>
    %c1 = arith.constant 1 : index
    %c0_2 = arith.constant 0 : index
    %c0_3 = arith.constant 0 : index
    %2 = vector.load %arg0[%c1, %c0_2, %c0_3] : memref<2x4x256xbf16, #tpu.memory_space<vmem>>, vector<1x4x256xbf16>
    %3 = vector.shape_cast %2 : vector<1x4x256xbf16> to vector<4x256xbf16>
    %4 = tpu.concatenate %1, %3 in 1 : vector<4x256xbf16>, vector<4x256xbf16> -> vector<4x512xbf16>
    %c0_4 = arith.constant 0 : index
    %c0_5 = arith.constant 0 : index
    %5 = vector.load %arg1[%c0_4, %c0_5] : memref<48x4xbf16, #tpu.memory_space<vmem>>, vector<48x4xbf16>
    %cst = arith.constant dense<0.000000e+00> : vector<48x512xf32>
    %6 = tpu.matmul %5, %4, %cst {dimension_numbers = #tpu.dot_dimension_numbers<[1], [0], [0], [1], [0, 0, 1, 1], [], []>} : vector<48x4xbf16>, vector<4x512xbf16>, vector<48x512xf32> -> vector<48x512xf32>
    %c0_6 = arith.constant 0 : index
    %c0_7 = arith.constant 0 : index
    %7 = vector.load %arg2[%c0_6, %c0_7] : memref<48x1xf32, #tpu.memory_space<vmem>>, vector<48x1xf32>
    %8 = vector.broadcast %7 : vector<48x1xf32> to vector<48x512xf32>
    %9 = arith.addf %6, %8 : vector<48x512xf32>
    %cst_8 = arith.constant 0.000000e+00 : f32
    %10 = vector.broadcast %cst_8 : f32 to vector<48x512xf32>
    %11 = arith.maximumf %9, %10 : vector<48x512xf32>
    %c0_9 = arith.constant 0 : index
    %c0_10 = arith.constant 0 : index
    %12 = vector.load %arg3[%c0_9, %c0_10] : memref<2x512xbf16, #tpu.memory_space<vmem>>, vector<2x512xbf16>
    %13 = arith.truncf %11 : vector<48x512xf32> to vector<48x512xbf16>
    %cst_11 = arith.constant dense<0.000000e+00> : vector<2x48xf32>
    %14 = tpu.matmul %12, %13, %cst_11 {dimension_numbers = #tpu.dot_dimension_numbers<[1], [1], [0], [0], [0, 0, 1, 0], [], []>} : vector<2x512xbf16>, vector<48x512xbf16>, vector<2x48xf32> -> vector<2x48xf32>
    %15 = arith.truncf %14 : vector<2x48xf32> to vector<2x48xbf16>
    %c0_12 = arith.constant 0 : index
    %c0_13 = arith.constant 0 : index
    %16 = vector.load %arg4[%c0_12, %c0_13] : memref<48x256xbf16, #tpu.memory_space<vmem>>, vector<48x256xbf16>
    %cst_14 = arith.constant dense<0.000000e+00> : vector<2x256xf32>
    %17 = tpu.matmul %15, %16, %cst_14 {dimension_numbers = #tpu.dot_dimension_numbers<[1], [0], [0], [1], [0, 0, 1, 1], [], []>} : vector<2x48xbf16>, vector<48x256xbf16>, vector<2x256xf32> -> vector<2x256xf32>
    %c0_15 = arith.constant 0 : index
    %c0_16 = arith.constant 0 : index
    %18 = vector.load %arg5[%c0_15, %c0_16] : memref<1x256xf32, #tpu.memory_space<vmem>>, vector<1x256xf32>
    %19 = vector.broadcast %18 : vector<1x256xf32> to vector<2x256xf32>
    %20 = arith.addf %17, %19 : vector<2x256xf32>
    %21 = vector.extract_strided_slice %20 {offsets = [0, 0], sizes = [2, 128], strides = [1, 1]} : vector<2x256xf32> to vector<2x128xf32>
    %22 = vector.extract_strided_slice %20 {offsets = [0, 128], sizes = [2, 128], strides = [1, 1]} : vector<2x256xf32> to vector<2x128xf32>
    %cst_17 = arith.constant dense<0xFF800000> : vector<2xf32>
    %23 = vector.multi_reduction <maximumf>, %22, %cst_17 [1] : vector<2x128xf32> to vector<2xf32>
    %24 = vector.shape_cast %23 : vector<2xf32> to vector<2x1xf32>
    %25 = vector.broadcast %24 : vector<2x1xf32> to vector<2x128xf32>
    %26 = arith.subf %22, %25 : vector<2x128xf32>
    %27 = math.exp %26 : vector<2x128xf32>
    %cst_18 = arith.constant dense<0.000000e+00> : vector<2xf32>
    %28 = vector.multi_reduction <add>, %27, %cst_18 [1] : vector<2x128xf32> to vector<2xf32>
    %29 = vector.shape_cast %28 : vector<2xf32> to vector<2x1xf32>
    %30 = math.log %29 : vector<2x1xf32>
    %31 = vector.broadcast %30 : vector<2x1xf32> to vector<2x128xf32>
    %32 = arith.subf %26, %31 : vector<2x128xf32>
    %cst_19 = arith.constant dense<0xFF800000> : vector<2xf32>
    %33 = vector.multi_reduction <maximumf>, %21, %cst_19 [1] : vector<2x128xf32> to vector<2xf32>
    %34 = vector.shape_cast %33 : vector<2xf32> to vector<2x1xf32>
    %35 = vector.broadcast %34 : vector<2x1xf32> to vector<2x128xf32>
    %36 = arith.subf %21, %35 : vector<2x128xf32>
    %37 = math.exp %36 : vector<2x128xf32>
    %cst_20 = arith.constant dense<0.000000e+00> : vector<2xf32>
    %38 = vector.multi_reduction <add>, %37, %cst_20 [1] : vector<2x128xf32> to vector<2xf32>
    %39 = vector.shape_cast %38 : vector<2xf32> to vector<2x1xf32>
    %40 = math.log %39 : vector<2x1xf32>
    %41 = vector.broadcast %40 : vector<2x1xf32> to vector<2x128xf32>
    %42 = arith.subf %36, %41 : vector<2x128xf32>
    %43 = math.exp %42 : vector<2x128xf32>
    %44 = arith.subf %42, %32 : vector<2x128xf32>
    %45 = arith.mulf %43, %44 : vector<2x128xf32>
    %c0_21 = arith.constant 0 : index
    %c0_22 = arith.constant 0 : index
    %46 = vector.load %arg6[%c0_21, %c0_22] : memref<2x128xf32, #tpu.memory_space<vmem>>, vector<2x128xf32>
    tpu.vector_store %arg6[%c0_21, %c0_22], %22 {strides = array<i32>} : memref<2x128xf32, #tpu.memory_space<vmem>>, vector<2x128xf32>,
    %47 = vector.shape_cast %45 : vector<2x128xf32> to vector<1x2x128xf32>
    %cst_23 = arith.constant dense<0.000000e+00> : vector<1xf32>
    %48 = vector.multi_reduction <add>, %47, %cst_23 [1, 2] : vector<1x2x128xf32> to vector<1xf32>
    %49 = vector.shape_cast %48 : vector<1xf32> to vector<1x1x1xf32>
    %50 = vector.extract %49[0, 0, 0] : f32 from vector<1x1x1xf32>
    %cst_24 = arith.constant 5.000000e-02 : f32
    %51 = arith.mulf %50, %cst_24 : f32
    %c0_25 = arith.constant 0 : index
    %c0_26 = arith.constant 0 : index
    %52 = memref.load %arg7[%c0_25, %c0_26] : memref<1x1xf32, #tpu.memory_space<smem>>
    memref.store %51, %arg7[%c0_25, %c0_26] : memref<1x1xf32, #tpu.memory_space<smem>>
    return
  }
}

</mosaic_0001>

<bundles_post_ra>
// kernel: tpu_custom_call.1
= control target key start
LH: loop header
LB: loop body
LE: loop exit
PB: predicated region body
PF: predicated region fallthrough
CT: control target
= control target key end

     0   :  { %13 = vsyncpa [#allocation3], 0  ;;  %vm116_vm0 = vcmask 1041408   ;;  %v653_v4 = vmov 0   ;;  %vm106_vm1 = vcmask 31744   ;;  %s812_s0 = inlined_call_operand.vmem [shape: bf16[2,4,256], index: 0, kind: input, shape index: {}]   ;;  %s813_s1 = inlined_call_operand.vmem [shape: bf16[48,4], index: 1, kind: input, shape index: {}]   ;;  %s814_s2 = inlined_call_operand.vmem [shape: f32[48,1], index: 2, kind: input, shape index: {}]   ;;  %s815_s3 = inlined_call_operand.vmem [shape: bf16[2,512], index: 3, kind: input, shape index: {}]   ;;  %s816_s4 = inlined_call_operand.vmem [shape: bf16[48,256], index: 4, kind: input, shape index: {}]   ;;  %s817_s5 = inlined_call_operand.vmem [shape: f32[1,256], index: 5, kind: input, shape index: {}]   ;;  %s818_s6 = inlined_call_operand.hbm [shape: f32[2,128], index: 6, kind: output, shape index: {0}]   ;;  %s819_s7 = inlined_call_operand.hbm [shape: f32[1,1], index: 7, kind: output, shape index: {1}]  }
   0x1   :  { %v565_v0 = vld.sshfl [vmem:[%s812_s0] sm:$0x33 pattern:$0x76325410]  ;;  %161 = vmatprep.mubr.bf16.mxu0 %v653_v4  ;;  %224 = vmatprep.mubr.bf16.mxu1 %v653_v4  ;;  %v57_v9 = vld [vmem:[%s814_s2 + $0x10] sm:$0xff]  ;;  %v56_v10 = vld [vmem:[%s814_s2 + $0x8] sm:$0xff] }
   0x2   :  { %v39_v1 = vcombine.high %v565_v0, %v565_v0  ;;  %v566_v2 = vld.sshfl [vmem:[%s812_s0 + $0x4] sm:$0x33 pattern:$0x76325410]  ;;  %v118_v3 = vsel %vm116_vm0, %v565_v0, 0  ;;  %593 = vset.pattern.permute.xlu0 %v653_v4  ;;  %594 = vset.pattern.permute.xlu1 %v653_v4  ;;  %v58_v11 = vld [vmem:[%s814_s2 + $0x18] sm:$0xff] }
   0x3   :  { %v48_v5 = vcombine.high %v566_v2, %v566_v2  ;;  %v124_v6 = vsel %vm116_vm0, %v566_v2, 0  ;;  %v595_v7 = vld [vmem:[%s813_s1] sm:$0xff]   ;;  %73 = vperm.xlu1 %594, %v57_v9  }
   0x4   :  { %570 = vmatprep.subr.msk.bf16.mxu0 %vm116_vm0, %v39_v1  ;;  %v55_v8 = vld [vmem:[%s814_s2] sm:$0xff] }
   0x5   :  { %574 = vmatprep.subr.msk.bf16.mxu1 %vm116_vm0, %v48_v5  ;;  %130 = vmatpush1.bf16.msra.mxu0 %v118_v3 }
   0x6   :  { %193 = vmatpush1.bf16.msra.mxu1 %v124_v6  ;;  %63 = vperm.xlu0 %593, %v55_v8  }
   0x8   :  { %571 = vmatmul.mubr.msk.bf16.vlgmr.msra.gmra.mrb[0].mxu0 %vm106_vm1, %v595_v7 }
   0x9   :  { %575 = vmatmul.mubr.msk.bf16.vlgmr.msra.gmra.mrb[0].mxu1 %vm106_vm1, %v595_v7  ;;  %171 = vmatprep.mubr.bf16.mxu0 %v653_v4 }
   0xa   :  { %234 = vmatprep.mubr.bf16.mxu1 %v653_v4 }
   0xb   :  { %14 = vsyncpa [#allocation4], 0  ;;  %68 = vperm.xlu0 %593, %v56_v10   ;;  %78 = vperm.xlu1 %594, %v58_v11   ;;  %v596_v12 = vld [vmem:[%s813_s1 + $0x8] sm:$0xff]   ;;  %v59_v13 = vld [vmem:[%s814_s2 + $0x20] sm:$0xff]  ;;  %v654_v16 = vmov 1966171168   ;;  %v304_v18 = vlaneseq }
   0xc   :  { %v60_v14 = vld [vmem:[%s814_s2 + $0x28] sm:$0xff]  ;;  %v597_v15 = vld [vmem:[%s813_s1 + $0x10] sm:$0xff]   ;;  %v302_v17 = vunpack.c.l.s4 %v654_v16  ;;  %v578_v21 = vld.sshfl [vmem:[%s815_s3] sm:$0x33 pattern:$0x75316420] }
   0xd   :  { %v748_v20 = vshrl.u32 %v304_v18, 7  ;;  %v300_v22 = vcombine.high %v578_v21, %v578_v21  ;;  %vm450_vm2 = vcmask 392192  }
   0xe   :  { %v303_v19 = vunpack.c.0.s8 %v302_v17 }
   0xf   :  { %83 = vperm.xlu0 %593, %v59_v13   ;;  %88 = vperm.xlu1 %594, %v60_v14  }
  0x10   :  { %572 = vmatmul.mubr.msk.bf16.gmra.mrb[4].mxu0 %vm106_vm1, %v596_v12  ;;  %v306_v23 = vsub.s32 %v303_v19, %v748_v20 }
  0x11   :  { %576 = vmatmul.mubr.msk.bf16.gmra.mrb[4].mxu1 %vm106_vm1, %v596_v12  ;;  %181 = vmatprep.mubr.bf16.mxu0 %v653_v4 }
  0x12   :  { %244 = vmatprep.mubr.bf16.mxu1 %v653_v4  ;;  %v754_v24 = vrot.slane %v578_v21, %v306_v23  ;;  %v314_v25 = vrot.slane %v300_v22, %v306_v23 }
  0x14   :  { %v316_v26 = vcombine.high %v314_v25, %v314_v25 }
  0x18   :  { %573 = vmatmul.mubr.msk.bf16.gmra.mrb[8].mxu0 %vm106_vm1, %v597_v15 }
  0x19   :  { %577 = vmatmul.mubr.msk.bf16.gmra.mrb[8].mxu1 %vm106_vm1, %v597_v15  ;;  %393 = vmatprep.mubr.bf16.mxu0 %v316_v26 }
  0x1a   :  { %353 = vmatprep.mubr.bf16.mxu1 %v314_v25 }
  0x82   :  { %v74_v28 = vpop.permute.xlu1 %73 }
  0x85   :  { %v64_v27 = vpop.permute.xlu0 %63 }
  0x8a   :  { %v69_v29 = vpop.permute.xlu0 %68  ;;  %v79_v56 = vpop.permute.xlu1 %78 }
  0x8e   :  { %v84_v18 = vpop.permute.xlu0 %83  ;;  %v89_v23 = vpop.permute.xlu1 %88 }
  0xdb   :  { %v163_v30 = vpop.f32.mrb[0].mxu0 }
  0xdc   :  { %v164_v31 = vadd.f32 %v163_v30, %v64_v27  ;;  %v226_v32 = vpop.f32.mrb[0].mxu1  ;;  %v165_v33 = vpop.f32.mrb[1].mxu0 }
  0xdd   :  { %v227_v34 = vadd.f32 %v226_v32, %v64_v27  ;;  %v166_v35 = vadd.f32 %v165_v33, %v64_v27  ;;  %v228_v36 = vpop.f32.mrb[1].mxu1  ;;  %v167_v37 = vpop.f32.mrb[2].mxu0 }
  0xde   :  { %v229_v38 = vadd.f32 %v228_v36, %v64_v27  ;;  %v168_v39 = vadd.f32 %v167_v37, %v69_v29  ;;  %v230_v40 = vpop.f32.mrb[2].mxu1  ;;  %v169_v41 = vpop.f32.mrb[3].mxu0  ;;  %v255_v45 = vmax.f32 %v164_v31, 0.0 }
  0xdf   :  { %v231_v42 = vadd.f32 %v230_v40, %v69_v29  ;;  %v170_v43 = vadd.f32 %v169_v41, %v69_v29  ;;  %v232_v44 = vpop.f32.mrb[3].mxu1  ;;  %v257_v48 = vmax.f32 %v227_v34, 0.0  ;;  %v256_v49 = vmax.f32 %v166_v35, 0.0 }
  0xe0   :  { %v259_v46 = vmax.f32 %v168_v39, 0.0  ;;  %v233_v47 = vadd.f32 %v232_v44, %v69_v29  ;;  %v258_v52 = vmax.f32 %v229_v38, 0.0 }
  0xe1   :  { %v261_v50 = vmax.f32 %v231_v42, 0.0  ;;  %v260_v51 = vmax.f32 %v170_v43, 0.0 }
  0xe2   :  { %v280_v53 = vpack.c.bf16 %v259_v46, %v255_v45  ;;  %v262_v54 = vmax.f32 %v233_v47, 0.0 }
  0xe3   :  { %v282_v55 = vpack.c.bf16 %v261_v50, %v257_v48  ;;  %v281_v57 = vpack.c.bf16 %v260_v51, %v256_v49  ;;  %v173_v58 = vpop.f32.mrb[4].mxu0 }
  0xe4   :  { %v283_v59 = vpack.c.bf16 %v262_v54, %v258_v52  ;;  %v174_v60 = vadd.f32 %v173_v58, %v74_v28  ;;  %v236_v61 = vpop.f32.mrb[4].mxu1  ;;  %v175_v62 = vpop.f32.mrb[5].mxu0  ;;  %v598_v58 = vld [vmem:[%s816_s4] ss:$8 sps:$4 sm:$0xff]  }
  0xe5   :  { %v237_v63 = vadd.f32 %v236_v61, %v74_v28  ;;  %v176_v0 = vadd.f32 %v175_v62, %v74_v28  ;;  %v238_v1 = vpop.f32.mrb[5].mxu1  ;;  %v177_v2 = vpop.f32.mrb[6].mxu0  ;;  %321 = vmatprep.subr.bf16.mxu1 %v281_v57  ;;  %v315_v57 = vcombine.high %v754_v24, %v754_v24  ;;  %v606_v61 = vld [vmem:[%s816_s4 + $0x24] ss:$8 sps:$4 sm:$0xff]   ;;  %v604_v62 = vld [vmem:[%s816_s4 + $0x20] ss:$8 sps:$4 sm:$0xff]  }
  0xe6   :  { %v239_v3 = vadd.f32 %v238_v1, %v74_v28  ;;  %v178_v5 = vadd.f32 %v177_v2, %v79_v56  ;;  %v240_v6 = vpop.f32.mrb[6].mxu1  ;;  %361 = vmatprep.subr.bf16.mxu0 %v283_v59  ;;  %v179_v7 = vpop.f32.mrb[7].mxu0  ;;  %322 = vmatpush1.bf16.xpose.msra.mxu1 %v280_v53  ;;  %v263_v11 = vmax.f32 %v174_v60, 0.0  ;;  %v603_v59 = vld [vmem:[%s816_s4 + $0x14] ss:$8 sps:$4 sm:$0xff]  }
  0xe7   :  { %v241_v8 = vadd.f32 %v240_v6, %v79_v56  ;;  %v180_v9 = vadd.f32 %v179_v7, %v79_v56  ;;  %v242_v10 = vpop.f32.mrb[7].mxu1  ;;  %362 = vmatpush1.bf16.xpose.msra.mxu0 %v282_v55  ;;  %v265_v14 = vmax.f32 %v237_v63, 0.0  ;;  %v264_v15 = vmax.f32 %v176_v0, 0.0  ;;  %v600_v55 = vld [vmem:[%s816_s4 + $0x4] ss:$8 sps:$4 sm:$0xff]  }
  0xe8   :  { %v267_v12 = vmax.f32 %v178_v5, 0.0  ;;  %v243_v13 = vadd.f32 %v242_v10, %v79_v56  ;;  %v266_v19 = vmax.f32 %v239_v3, 0.0  ;;  %v601_v60 = vld [vmem:[%s816_s4 + $0x10] ss:$8 sps:$4 sm:$0xff]   ;;  %v416_v10 = vsub.s32 1, %v748_v20  ;;  %s655_s4 = smov [#allocation2]  }
  0xe9   :  { %v269_v16 = vmax.f32 %v241_v8, 0.0  ;;  %v268_v17 = vmax.f32 %v180_v9, 0.0  ;;  %v412_v8 = vsub.s32 0, %v748_v20  ;;  %v408_v9 = vld [vmem:[%s817_s5] sm:$0x3]  ;;  %s543_s5 = sshll.u32 %s655_s4, 4  ;;  %s544_s5 = int_to_ptr.vmem [resolvable:$true] %s543_s5 }
  0xea   :  { %v284_v21 = vpack.c.bf16 %v267_v12, %v263_v11  ;;  %v270_v22 = vmax.f32 %v243_v13, 0.0  ;;  %v417_v12 = vrot.slane %v408_v9, %v416_v10  ;;  %s617_s11 = scalar_lea.vmem %s544_s5, 32  ;;  %p622_p1 = scmp.lt.s32.totalorder %s544_s5, %s544_s5 }
  0xeb   :  { %v286_v25 = vpack.c.bf16 %v269_v16, %v265_v14  ;;  %v285_v26 = vpack.c.bf16 %v268_v17, %v264_v15  ;;  %v183_v27 = vpop.f32.mrb[8].mxu0  ;;  %v413_v11 = vrot.slane %v408_v9, %v412_v8  ;;  %p618_p0 = scmp.ne.s32.totalorder %s544_s5, %s617_s11  ;;  %p623_p2 = scmp.lt.s32.totalorder %s617_s11, %s617_s11 }
  0xec   :  { %v287_v28 = vpack.c.bf16 %v270_v22, %v266_v19  ;;  %v184_v29 = vadd.f32 %v183_v27, %v84_v18  ;;  %v246_v30 = vpop.f32.mrb[8].mxu1  ;;  %v185_v31 = vpop.f32.mrb[9].mxu0 }
  0xed   :  { %v247_v32 = vadd.f32 %v246_v30, %v84_v18  ;;  %v186_v33 = vadd.f32 %v185_v31, %v84_v18  ;;  %v248_v34 = vpop.f32.mrb[9].mxu1  ;;  %v187_v35 = vpop.f32.mrb[10].mxu0  ;;  %323 = vmatprep.subr.bf16.mxu1 %v285_v26  ;;  %p624_p3 = por %p623_p2, %p622_p1 }
  0xee   :  { %v249_v36 = vadd.f32 %v248_v34, %v84_v18  ;;  %v188_v37 = vadd.f32 %v187_v35, %v89_v23  ;;  %v250_v38 = vpop.f32.mrb[10].mxu1  ;;  %363 = vmatprep.subr.bf16.mxu0 %v287_v28  ;;  %v189_v39 = vpop.f32.mrb[11].mxu0  ;;  %324 = vmatpush1.bf16.xpose.msra.mxu1 %v284_v21  ;;  %v271_v43 = vmax.f32 %v184_v29, 0.0 }
  0xef   :  { %v251_v40 = vadd.f32 %v250_v38, %v89_v23  ;;  %v190_v41 = vadd.f32 %v189_v39, %v89_v23  ;;  %v252_v42 = vpop.f32.mrb[11].mxu1  ;;  %364 = vmatpush1.bf16.xpose.msra.mxu0 %v286_v25  ;;  %v273_v46 = vmax.f32 %v247_v32, 0.0  ;;  %v272_v47 = vmax.f32 %v186_v33, 0.0  ;;  %p625_p4 = pnand %p624_p3, %p618_p0 }
  0xf0   :  { %v275_v44 = vmax.f32 %v188_v37, 0.0  ;;  %v253_v45 = vadd.f32 %v252_v42, %v89_v23  ;;  %v274_v50 = vmax.f32 %v249_v36, 0.0 }
  0xf1   :  { %v277_v48 = vmax.f32 %v251_v40, 0.0  ;;  %v276_v49 = vmax.f32 %v190_v41, 0.0 }
  0xf2   :  { %v288_v51 = vpack.c.bf16 %v275_v44, %v271_v43  ;;  %v278_v52 = vmax.f32 %v253_v45, 0.0 }
  0xf3   :  { %v290_v53 = vpack.c.bf16 %v277_v48, %v273_v46  ;;  %v289_v54 = vpack.c.bf16 %v276_v49, %v272_v47 }
  0xf4   :  { %v291_v56 = vpack.c.bf16 %v278_v52, %v274_v50 }
  0xf5   :  { %325 = vmatprep.subr.bf16.mxu1 %v289_v54 }
  0xf6   :  { %365 = vmatprep.subr.bf16.mxu0 %v291_v56  ;;  %326 = vmatpush1.bf16.xpose.msra.mxu1 %v288_v51 }
  0xf7   :  { %366 = vmatpush1.bf16.xpose.msra.mxu0 %v290_v53  ;;  %454 = vmatprep.subr.bf16.mxu1 %v600_v55 }
  0xfd   :  { %354 = vmatmul.mubr.bf16.vlgmr.msra.gmra.mrb[12].mxu1 %v754_v24 }
  0xfe   :  { %394 = vmatmul.mubr.bf16.vlgmr.msra.gmra.mrb[12].mxu0 %v315_v57  ;;  %455 = vmatpush1.bf16.msra.mxu1 %v598_v58 }
  0xff   :  { %456 = vmatprep.subr.bf16.mxu1 %v603_v59  ;;  %486 = vmatprep.mubr.bf16.mxu1 %v653_v4 }
 0x102   :  { %457 = vmatpush1.bf16.msra.mxu1 %v601_v60 }
 0x103   :  { %458 = vmatprep.subr.bf16.mxu1 %v606_v61 }
 0x106   :  { %459 = vmatpush1.bf16.msra.mxu1 %v604_v62 }
 0x1d0   :  { %v355_v24 = vpop.f32.mrb[12].mxu1 }
 0x1d1   :  { %v395_v63 = vpop.f32.mrb[12].mxu0  ;;  %v357_v0 = vpop.f32.mrb[13].mxu1 }
 0x1d2   :  { %v396_v1 = vadd.f32 %v395_v63, %v355_v24  ;;  %v397_v2 = vpop.f32.mrb[13].mxu0  ;;  %v358_v3 = vpop.f32.mrb[14].mxu1 }
 0x1d3   :  { %v398_v5 = vpop.f32.mrb[14].mxu0  ;;  %v359_v6 = vpop.f32.mrb[15].mxu1 }
 0x1d4   :  { %v401_v4 = vpack.c.bf16 %v396_v1, %v396_v1  ;;  %v399_v7 = vpop.f32.mrb[15].mxu0 }
 0x1d6   :  { %585 = vmatmul.mubr.msk.bf16.vlgmr.msra.gmra.mrb[16].mxu1 %vm450_vm2, %v401_v4 }
 0x2a9   :  { %v488_v13 = vpop.f32.mrb[16].mxu1 }
 0x2aa   :  { %v489_v14 = vadd.f32 %v488_v13, %v413_v11  ;;  %v490_v15 = vpop.f32.mrb[17].mxu1 }
 0x2ab   :  { %v491_v16 = vadd.f32 %v490_v15, %v417_v12  ;;  %v492_v17 = vpop.f32.mrb[18].mxu1 }
 0x2ac   :  { %v493_v18 = vpop.f32.mrb[19].mxu1  ;;  %v507_v19 = vsel %vm116_vm0, %v489_v14, -inf }
 0x2ad   :  { %523 = vst [vmem:[#allocation2] sm:$0x3] %v491_v16  ;;  %508 = vmax.xlane.f32.xlu0 %v507_v19  ;;  %v495_v21 = vsel %vm116_vm0, %v491_v16, -inf }
 0x2ae   :  { %496 = vmax.xlane.f32.xlu1 %v495_v21 }
 0x33a   :  { %v509_v22 = vpop.xlane.xlu0 %508 }
 0x33b   :  { %v510_v23 = vsub.f32 %v489_v14, %v509_v22  ;;  %v497_v25 = vpop.xlane.xlu1 %496 }
 0x33c   :  { %v498_v26 = vsub.f32 %v491_v16, %v497_v25 }
 0x33d   :  { %v511_v20 = vmul.f32 1.442695, %v510_v23 }
 0x33e   :  { %v499_v27 = vmul.f32 1.442695, %v498_v26 }
 0x33f   :  { %607 = vpow2.f32 %v511_v20 }
 0x340   :  { %609 = vpow2.f32 %v499_v27 }
 0x349   :  { %v608_v28 = vpop.eup %607 }
 0x34a   :  { %v513_v29 = vsel %vm116_vm0, %v608_v28, 0.0  ;;  %v610_v30 = vpop.eup %609 }
 0x34b   :  { %514 = vadd.xlane.f32.xlu0 %v513_v29  ;;  %v501_v31 = vsel %vm116_vm0, %v610_v30, 0.0 }
 0x34f   :  { %502 = vadd.xlane.f32.xlu0 %v501_v31 }
 0x3d8   :  { %v515_v32 = vpop.xlane.xlu0 %514 }
 0x3d9   :  { %611 = vlog2.f32 %v515_v32 }
 0x3dc   :  { %v503_v33 = vpop.xlane.xlu0 %502 }
 0x3dd   :  { %613 = vlog2.f32 %v503_v33 }
 0x3e3   :  { %v612_v34 = vpop.eup %611 }
 0x3e4   :  { %v517_v35 = vmul.f32 0.6931472, %v612_v34 }
 0x3e6   :  { %v518_v36 = vsub.f32 %v510_v23, %v517_v35 }
 0x3e7   :  { %v614_v37 = vpop.eup %613 }
 0x3e8   :  { %v519_v38 = vmul.f32 1.442695, %v518_v36  ;;  %v505_v39 = vmul.f32 0.6931472, %v614_v37 }
 0x3ea   :  { %615 = vpow2.f32 %v519_v38  ;;  %v506_v40 = vsub.f32 %v498_v26, %v505_v39 }
 0x3ec   :  { %v521_v41 = vsub.f32 %v518_v36, %v506_v40 }
 0x3f4   :  { %v616_v42 = vpop.eup %615 }
 0x3f5   :  { %v522_v43 = vmul.f32 %v616_v42, %v521_v41 }
 0x3f7   :  { %v524_v44 = vsel %vm116_vm0, %v522_v43, 0.0 }
 0x3f8   :  { %525 = vadd.xlane.f32.xlu1 %v524_v44 }
 0x3f9   :  { %628 = shalt.err (!%p625_p4)
}
 0x3fa   :  { %s629_s14 = scalar_lea.hbm %s818_s6, 32 }
 0x3fb   :  { %p630_p5 = scmp.ne.s32.totalorder %s818_s6, %s629_s14  ;;  %p633_p6 = scmp.lt.u32.totalorder %s629_s14, %s818_s6 }
 0x3fd   :  { %p635_p7 = pnand %p633_p6, %p630_p5 }
 0x3ff   :  { %638 = shalt.err (!%p635_p7)
}
 0x400   :  { %546 = dma.vmem_to_hbm [thread:$0]  %s544_s5, 32, %s818_s6, [#allocation3]  }
 0x401   :  { %s639_s3 = scalar_lea.hbm %s819_s7, 16 }
 0x402   :  { %p640_p8 = scmp.ne.s32.totalorder %s819_s7, %s639_s3  ;;  %p643_p9 = scmp.lt.u32.totalorder %s639_s3, %s819_s7 }
 0x404   :  { %p645_p10 = pnand %p643_p9, %p640_p8 }
 0x485   :  { %v526_v45 = vpop.xlane.xlu1 %525 }
 0x486   :  { %v527_v46 = vrot.slane %v526_v45, 4 }
 0x488   :  { %v528_v47 = vadd.f32 %v527_v46, %v526_v45 }
 0x48a   :  { %v529_v48 = vrot.slane %v528_v47, 2 }
 0x48c   :  { %v530_v49 = vadd.f32 %v529_v48, %v528_v47 }
 0x48e   :  { %v531_v50 = vrot.slane %v530_v49, 1 }
 0x490   :  { %v532_v51 = vadd.f32 %v531_v50, %v530_v49 }
 0x492   :  { %587 = vpush %v532_v51 }
 0x4c3   :  { %s588_s21 = spop %587 }
 0x4c4   :  { %s534_s2 = smul.f32 0.05, %s588_s21 }
 0x4c6   :  { %536 = sst [smem:[#allocation5]] %s534_s2 }
 0x4c7   :  { %648 = shalt.err (!%p645_p10)
}
 0x4c8   :  { %s656_s26 = smov [#allocation5]  }
 0x4c9   :  { %554 = dma.smem_to_hbm %s656_s26, 16, %s819_s7, [#allocation4]  }
 0x4ca   :  { %649 = dma.done.wait [#allocation3], 32  }
 0x4cb   :  { %650 = vsyncadd [#allocation3], 4294967264 }
 0x4cc   :  { %651 = dma.done.wait [#allocation4], 16  }
 0x4cd   :  { %652 = vsyncadd [#allocation4], 4294967280 }
 0x4ce   :  { %561 = sfence }
 0x4cf   :  { %562 = vsyncpa [#allocation3], 1 }
 0x4d0   :  { %563 = vsyncpa [#allocation4], 1 }

</bundles_post_ra>
